<compile_context>
chip_gen: v6e
topology: v6e:2x2x1
jax: 0.10.0
libtpu: 0.0.40
codegen_flags: <defaults>
</compile_context>

<pallas_src>
import functools

import jax
import jax.numpy as jnp
from jax.experimental import pallas as pl
from jax.experimental.pallas import tpu as pltpu

# Model hyperparameters (nn.Module __init__ args).
NUM_HIDDEN = 3          # -> num_middle = NUM_HIDDEN - 1 = 2 middle layers
DIM_HIDDEN = 32
NUM_MIDDLE = NUM_HIDDEN - 1
LANE = 128


def pinn_kernel(xt_ref, wp_ref, w_mid_ref, b_mid_ref, b_out_ref, o_ref):
    # Batch-on-lanes: xt_ref is (2, TN); activations are (H, TN).
    xt = xt_ref[...]                                      # (2, TN)
    x_row = xt[0:1, :]                                    # (1, TN)
    t_row = xt[1:2, :]                                    # (1, TN)

    wp = wp_ref[...]                                      # (H, 4) packed params
    wx = wp[:, 0:1]                                       # W_in[:, 0]
    wt = wp[:, 1:2]                                       # W_in[:, 1]
    b_in = wp[:, 2:3]                                     # b_in
    w_out = wp[:, 3:4]                                    # W_out column

    # layer_in as VPU broadcast FMAs (a K=2 MXU matmul would be pure overhead):
    #   h[f, n] = W_in[f, 0] * x[n] + W_in[f, 1] * t[n] + b_in[f]
    h = jnp.tanh(wx * x_row + wt * t_row + b_in)          # (H, TN)

    # middle layers on the MXU, lane-dense output:  h <- tanh(W_mid @ h + b_mid)
    for l in range(w_mid_ref.shape[0]):
        h = jnp.tanh(
            jnp.dot(w_mid_ref[l], h, preferred_element_type=jnp.float32)
            + b_mid_ref[l]
        )

    # layer_out: VPU multiply + sublane reduce (XLU) -> lane-dense (1, TN) store.
    out = jnp.sum(h * w_out, axis=0, keepdims=True) + b_out_ref[0, 0]
    o_ref[...] = out.astype(o_ref.dtype)


@functools.partial(jax.jit, static_argnames=("tile_n",))
def pinn_forward(x, t, params, tile_n=8192):
    w_in, b_in, w_mid, b_mid, w_out, b_out = params
    N = x.shape[0]
    H = w_in.shape[0]
    NM = w_mid.shape[0]

    # Batch on the lane axis; tile is a multiple of 128, no bigger than needed.
    n_up = ((N + LANE - 1) // LANE) * LANE
    eff_tile = min(((tile_n + LANE - 1) // LANE) * LANE, n_up)
    # Keep the grid at >= 2 steps when there is enough work so that
    # dimension_semantics=("parallel",) can use both TensorCores on v7x.
    if n_up >= 2 * LANE:
        eff_tile = min(eff_tile, (n_up // (2 * LANE)) * LANE)
    n_pad = ((N + eff_tile - 1) // eff_tile) * eff_tile

    # Single fused pad of the merged (2, N) input (one DMA'd block per step).
    xt = jnp.concatenate([x, t], axis=1).T                # (2, N)
    xt = jnp.pad(xt, ((0, 0), (0, n_pad - N)))            # (2, n_pad)

    # Pack the four (H,1) per-feature params into one (H,4) block -> one constant DMA.
    w_pack = jnp.concatenate([w_in[:, 0:1], w_in[:, 1:2], b_in, w_out], axis=1)

    grid = (n_pad // eff_tile,)
    const2 = lambda i: (0, 0)
    const3 = lambda i: (0, 0, 0)

    out_row = pl.pallas_call(
        pinn_kernel,
        out_shape=jax.ShapeDtypeStruct((1, n_pad), jnp.float32),
        grid_spec=pltpu.PrefetchScalarGridSpec(
            num_scalar_prefetch=0,
            grid=grid,
            in_specs=[
                pl.BlockSpec((2, eff_tile), lambda i: (0, i)),        # [x; t] rows (lane-dense)
                pl.BlockSpec((H, 4), const2),                         # packed per-feature params
                pl.BlockSpec((NM, H, H), const3),                     # middle W's
                pl.BlockSpec((NM, H, 1), const3),                     # middle b's
                pl.BlockSpec(memory_space=pltpu.MemorySpace.SMEM),    # b_out scalar
            ],
            out_specs=pl.BlockSpec((1, eff_tile), lambda i: (0, i)),  # lane-dense output
        ),
        compiler_params=pltpu.CompilerParams(
            dimension_semantics=("parallel",),
        ),
    )(xt, w_pack, w_mid, b_mid, b_out)

    return out_row[0, :N].reshape(N, 1)


def init_params(key, dim_hidden=DIM_HIDDEN, num_middle=NUM_MIDDLE):
    """Deterministic init mimicking nn.Linear's U(-1/sqrt(fan_in), 1/sqrt(fan_in)),
    stored in the kernel-native (batch-on-lanes) layouts described above."""
    ks = jax.random.split(key, 6)

    def unif(k, shape, fan_in):
        bound = 1.0 / jnp.sqrt(fan_in)
        return jax.random.uniform(k, shape, jnp.float32, -bound, bound)

    w_in = unif(ks[0], (dim_hidden, 2), 2.0)                            # torch (out, in)
    b_in = unif(ks[1], (dim_hidden, 1), 2.0)
    w_mid = unif(ks[2], (num_middle, dim_hidden, dim_hidden), float(dim_hidden))
    b_mid = unif(ks[3], (num_middle, dim_hidden, 1), float(dim_hidden))
    w_out = unif(ks[4], (dim_hidden, 1), float(dim_hidden))             # torch weight.T
    b_out = unif(ks[5], (1, 1), float(dim_hidden))
    return (w_in, b_in, w_mid, b_mid, w_out, b_out)


def pinn_forward_ref(x, t, params):
    """Pure-JAX reference (torch semantics) for correctness check."""
    w_in, b_in, w_mid, b_mid, w_out, b_out = params
    xs = jnp.concatenate([x, t], axis=1)                  # (N, 2)
    h = jnp.tanh(xs @ w_in.T + b_in[:, 0])                # (N, H)
    for l in range(w_mid.shape[0]):
        h = jnp.tanh(h @ w_mid[l].T + b_mid[l, :, 0])
    return h @ w_out + b_out[0, 0]                        # (N, 1)


if __name__ == "__main__":
    key = jax.random.PRNGKey(0)
    k_p, k_x, k_t = jax.random.split(key, 3)

    N = 200  # batch of collocation points (deliberately not a multiple of 128)
    x = jax.random.uniform(k_x, (N, 1), jnp.float32)
    t = jax.random.uniform(k_t, (N, 1), jnp.float32)
    params = init_params(k_p)

    out = pinn_forward(x, t, params)
    out = jax.block_until_ready(out)

    ref = pinn_forward_ref(x, t, params)
    assert out.shape == (N, 1)
    assert jnp.allclose(out, ref, atol=1e-5, rtol=1e-5), "mismatch vs reference"

    print("KERNEL_OK")
</pallas_src>

<mosaic_0001>
module attributes {stable_mosaic.version = 11 : i64} {
  func.func @pinn_kernel(%arg0: i32, %arg1: memref<2x128xf32, #tpu.memory_space<vmem>>, %arg2: memref<32x4xf32, #tpu.memory_space<vmem>>, %arg3: memref<2x32x32xf32, #tpu.memory_space<vmem>>, %arg4: memref<2x32x1xf32, #tpu.memory_space<vmem>>, %arg5: memref<1x1xf32, #tpu.memory_space<smem>>, %arg6: memref<1x128xf32, #tpu.memory_space<vmem>>) attributes {dimension_semantics = [#tpu.dimension_semantics<parallel>], iteration_bounds = array<i64: 2>, scalar_prefetch = 0 : i64, scratch_operands = 0 : i64, tpu.core_type = #tpu.core_type<tc>, window_params = [{transform_indices = @transform_0, window_bounds = array<i64: 2, 128>}, {pipeline_mode = #tpu.pipeline_mode<synchronous>, transform_indices = @transform_1, window_bounds = array<i64: 32, 4>}, {pipeline_mode = #tpu.pipeline_mode<synchronous>, transform_indices = @transform_2, window_bounds = array<i64: 2, 32, 32>}, {pipeline_mode = #tpu.pipeline_mode<synchronous>, transform_indices = @transform_3, window_bounds = array<i64: 2, 32, 1>}, {transform_indices = @transform_4, window_bounds = array<i64: 1, 1>}, {transform_indices = @transform_5, window_bounds = array<i64: 1, 128>}]} {
    %c0 = arith.constant 0 : index
    %c0_0 = arith.constant 0 : index
    %0 = vector.load %arg1[%c0, %c0_0] : memref<2x128xf32, #tpu.memory_space<vmem>>, vector<2x128xf32>
    %1 = vector.extract_strided_slice %0 {offsets = [0, 0], sizes = [1, 128], strides = [1, 1]} : vector<2x128xf32> to vector<1x128xf32>
    %2 = vector.extract_strided_slice %0 {offsets = [1, 0], sizes = [1, 128], strides = [1, 1]} : vector<2x128xf32> to vector<1x128xf32>
    %c0_1 = arith.constant 0 : index
    %c0_2 = arith.constant 0 : index
    %3 = vector.load %arg2[%c0_1, %c0_2] : memref<32x4xf32, #tpu.memory_space<vmem>>, vector<32x4xf32>
    %4 = vector.extract_strided_slice %3 {offsets = [0, 0], sizes = [32, 1], strides = [1, 1]} : vector<32x4xf32> to vector<32x1xf32>
    %5 = vector.extract_strided_slice %3 {offsets = [0, 1], sizes = [32, 1], strides = [1, 1]} : vector<32x4xf32> to vector<32x1xf32>
    %6 = vector.extract_strided_slice %3 {offsets = [0, 2], sizes = [32, 1], strides = [1, 1]} : vector<32x4xf32> to vector<32x1xf32>
    %7 = vector.extract_strided_slice %3 {offsets = [0, 3], sizes = [32, 1], strides = [1, 1]} : vector<32x4xf32> to vector<32x1xf32>
    %8 = vector.broadcast %4 : vector<32x1xf32> to vector<32x128xf32>
    %9 = vector.broadcast %1 : vector<1x128xf32> to vector<32x128xf32>
    %10 = arith.mulf %8, %9 : vector<32x128xf32>
    %11 = vector.broadcast %5 : vector<32x1xf32> to vector<32x128xf32>
    %12 = vector.broadcast %2 : vector<1x128xf32> to vector<32x128xf32>
    %13 = arith.mulf %11, %12 : vector<32x128xf32>
    %14 = arith.addf %10, %13 : vector<32x128xf32>
    %15 = vector.broadcast %6 : vector<32x1xf32> to vector<32x128xf32>
    %16 = arith.addf %14, %15 : vector<32x128xf32>
    %17 = math.tanh %16 : vector<32x128xf32>
    %c0_3 = arith.constant 0 : index
    %c0_4 = arith.constant 0 : index
    %c0_5 = arith.constant 0 : index
    %18 = vector.load %arg3[%c0_3, %c0_4, %c0_5] : memref<2x32x32xf32, #tpu.memory_space<vmem>>, vector<1x32x32xf32>
    %19 = vector.shape_cast %18 : vector<1x32x32xf32> to vector<32x32xf32>
    %cst = arith.constant dense<0.000000e+00> : vector<32x128xf32>
    %20 = tpu.matmul %19, %17, %cst {dimension_numbers = #tpu.dot_dimension_numbers<[1], [0], [0], [1], [0, 0, 1, 1], [], []>} : vector<32x32xf32>, vector<32x128xf32>, vector<32x128xf32> -> vector<32x128xf32>
    %c0_6 = arith.constant 0 : index
    %c0_7 = arith.constant 0 : index
    %c0_8 = arith.constant 0 : index
    %21 = vector.load %arg4[%c0_6, %c0_7, %c0_8] : memref<2x32x1xf32, #tpu.memory_space<vmem>>, vector<1x32x1xf32>
    %22 = vector.shape_cast %21 : vector<1x32x1xf32> to vector<32x1xf32>
    %23 = vector.broadcast %22 : vector<32x1xf32> to vector<32x128xf32>
    %24 = arith.addf %20, %23 : vector<32x128xf32>
    %25 = math.tanh %24 : vector<32x128xf32>
    %c1 = arith.constant 1 : index
    %c0_9 = arith.constant 0 : index
    %c0_10 = arith.constant 0 : index
    %26 = vector.load %arg3[%c1, %c0_9, %c0_10] : memref<2x32x32xf32, #tpu.memory_space<vmem>>, vector<1x32x32xf32>
    %27 = vector.shape_cast %26 : vector<1x32x32xf32> to vector<32x32xf32>
    %cst_11 = arith.constant dense<0.000000e+00> : vector<32x128xf32>
    %28 = tpu.matmul %27, %25, %cst_11 {dimension_numbers = #tpu.dot_dimension_numbers<[1], [0], [0], [1], [0, 0, 1, 1], [], []>} : vector<32x32xf32>, vector<32x128xf32>, vector<32x128xf32> -> vector<32x128xf32>
    %c1_12 = arith.constant 1 : index
    %c0_13 = arith.constant 0 : index
    %c0_14 = arith.constant 0 : index
    %29 = vector.load %arg4[%c1_12, %c0_13, %c0_14] : memref<2x32x1xf32, #tpu.memory_space<vmem>>, vector<1x32x1xf32>
    %30 = vector.shape_cast %29 : vector<1x32x1xf32> to vector<32x1xf32>
    %31 = vector.broadcast %30 : vector<32x1xf32> to vector<32x128xf32>
    %32 = arith.addf %28, %31 : vector<32x128xf32>
    %33 = math.tanh %32 : vector<32x128xf32>
    %34 = vector.broadcast %7 : vector<32x1xf32> to vector<32x128xf32>
    %35 = arith.mulf %33, %34 : vector<32x128xf32>
    %cst_15 = arith.constant dense<0.000000e+00> : vector<128xf32>
    %36 = vector.multi_reduction <add>, %35, %cst_15 [0] : vector<32x128xf32> to vector<128xf32>
    %37 = vector.shape_cast %36 : vector<128xf32> to vector<1x128xf32>
    %c0_16 = arith.constant 0 : index
    %c0_17 = arith.constant 0 : index
    %38 = memref.load %arg5[%c0_16, %c0_17] : memref<1x1xf32, #tpu.memory_space<smem>>
    %39 = vector.broadcast %38 : f32 to vector<1x128xf32>
    %40 = arith.addf %37, %39 : vector<1x128xf32>
    %c0_18 = arith.constant 0 : index
    %c0_19 = arith.constant 0 : index
    %41 = vector.load %arg6[%c0_18, %c0_19] : memref<1x128xf32, #tpu.memory_space<vmem>>, vector<1x128xf32>
    tpu.vector_store %arg6[%c0_18, %c0_19], %40 {strides = array<i32>} : memref<1x128xf32, #tpu.memory_space<vmem>>, vector<1x128xf32>,
    return
  }
  func.func @transform_0(%arg0: i32) -> (i32, i32) {
    %c0_i32 = arith.constant 0 : i32
    %c0_i32_0 = arith.constant 0 : i32
    return %c0_i32, %arg0 : i32, i32
  }
  func.func @transform_1(%arg0: i32) -> (i32, i32) {
    %c0_i32 = arith.constant 0 : i32
    %c0_i32_0 = arith.constant 0 : i32
    %c0_i32_1 = arith.constant 0 : i32
    return %c0_i32, %c0_i32_0 : i32, i32
  }
  func.func @transform_2(%arg0: i32) -> (i32, i32, i32) {
    %c0_i32 = arith.constant 0 : i32
    %c0_i32_0 = arith.constant 0 : i32
    %c0_i32_1 = arith.constant 0 : i32
    %c0_i32_2 = arith.constant 0 : i32
    return %c0_i32, %c0_i32_0, %c0_i32_1 : i32, i32, i32
  }
  func.func @transform_3(%arg0: i32) -> (i32, i32, i32) {
    %c0_i32 = arith.constant 0 : i32
    %c0_i32_0 = arith.constant 0 : i32
    %c0_i32_1 = arith.constant 0 : i32
    %c0_i32_2 = arith.constant 0 : i32
    return %c0_i32, %c0_i32_0, %c0_i32_1 : i32, i32, i32
  }
  func.func @transform_4(%arg0: i32) -> (i32, i32) {
    %c0_i32 = arith.constant 0 : i32
    %c0_i32_0 = arith.constant 0 : i32
    %c0_i32_1 = arith.constant 0 : i32
    return %c0_i32, %c0_i32_0 : i32, i32
  }
  func.func @transform_5(%arg0: i32) -> (i32, i32) {
    %c0_i32 = arith.constant 0 : i32
    %c0_i32_0 = arith.constant 0 : i32
    return %c0_i32, %arg0 : i32, i32
  }
}

</mosaic_0001>

<bundles_post_ra>
// kernel: pinn_forward.1
= control target key start
LH: loop header
LB: loop body
LE: loop exit
PB: predicated region body
PF: predicated region fallthrough
CT: control target
= control target key end

     0   :  { %s807_s20 = smov 0   ;;  %s924_s0 = inlined_call_operand.vmem [shape: f32[2,256], index: 0, kind: input, shape index: {}]   ;;  %s925_s1 = inlined_call_operand.vmem [shape: f32[32,4], index: 1, kind: input, shape index: {}]   ;;  %s926_s2 = inlined_call_operand.vmem [shape: f32[2,32,32], index: 2, kind: input, shape index: {}]   ;;  %s927_s3 = inlined_call_operand.vmem [shape: f32[2,32,1], index: 3, kind: input, shape index: {}]   ;;  %s928_s4 = inlined_call_operand.<no memory space> [shape: f32[1,1], index: 4, kind: input, shape index: {}]   ;;  %s929_s5 = inlined_call_operand.vmem [shape: f32[1,256], index: 5, kind: output, shape index: {}]  }
   0x1   :  { %10 = sst [smem:[#allocation2]] %s928_s4 }
   0x2 LB: > { %s645_s21 = sadd.s32 4294967295, %s768_s20   ;;  %p649_p0 = scmp.ge.s32.totalorder %s768_s20, 1  ;;  %s768_s20 = sphi %s807_s20, %s16_s20  }
   0x3   : > { %p187_p1 = scmp.lt.s32.totalorder %s768_s20, 3 }
   0x5   : > { %p188_p2 = pnand %p649_p0, %p187_p1 }
   0x6   : > { %p212_p3 = scmp.lt.s32.totalorder (!%p188_p2), %s645_s21, 1  ;;  %s594_s16 = sld [smem:[#allocation2]] (!%p188_p2) }
   0x7   : > { %191 = sbr.rel (%p188_p2) target bundleno = 642 (0x282), region = 40 }
   0xc   : > { %v818_v0 = vld [vmem:[%s925_s1 + $0x18] sm:$0xff]  ;;  %v823_v1 = vld [vmem:[%s925_s1 + $0x10] sm:$0xff]  ;;  %v770_v2 = vmov 1   ;;  %v771_v3 = vmov 0   ;;  %v830_v4 = vld [vmem:[%s925_s1 + $0x8] sm:$0xff]  ;;  %v772_v6 = vmov 2   ;;  %v244_v16 = vlaneseq }
   0xd   : > { %725 = vset.pattern.permute.xlu0 %v770_v2  ;;  %726 = vset.pattern.permute.xlu1 %v771_v3  ;;  %v839_v5 = vld [vmem:[%s925_s1] sm:$0xff]  ;;  %vm332_vm0 = vcmask 261120   ;;  %v311_v8 = vld [vmem:[%s927_s3 + $0x18] sm:$0xff]  ;;  %v310_v9 = vld [vmem:[%s927_s3 + $0x10] sm:$0xff]  ;;  %s931_s21 = smov (!%p212_p3, %s645_s21), 1  ;;  %v773_v59 = vmov 3  }
   0xe   : > { %265 = vperm.xlu0 %725, %v818_v0   ;;  %236 = vperm.xlu1 %726, %v823_v1   ;;  %v304_v7 = vld [vmem:[%s926_s2] sm:$0xff]  ;;  %v309_v10 = vld [vmem:[%s927_s3 + $0x8] sm:$0xff]  ;;  %v661_v13 = vld [vmem:[%s927_s3 + $0x30] sm:$0xff]  ;;  %s650_s4 = sshll.u32 %s931_s21, 1  ;;  %v245_v17 = vshrl.u32 %v244_v16, 7  ;;  %s218_s19 = scalar_lea.vmem %s929_s5, %s931_s21 }
   0xf   : > { %693 = vmatprep.mubr.msk.f32.mxu0 %vm332_vm0, %v304_v7  ;;  %v659_v11 = vld [vmem:[%s927_s3 + $0x20] sm:$0xff]  ;;  %v660_v14 = vld [vmem:[%s927_s3 + $0x28] sm:$0xff]  ;;  %v662_v15 = vld [vmem:[%s927_s3 + $0x38] sm:$0xff]  ;;  %s215_s26 = scalar_lea.vmem %s924_s0, %s650_s4 }
  0x10   : > { %v308_v12 = vld [vmem:[%s927_s3] sm:$0xff]  ;;  %v246_v20 = vsub.s32 0, %v245_v17  ;;  %v270_v21 = vsub.s32 1, %v245_v17  ;;  %v305_v55 = vld [vmem:[%s926_s2 + $0x8] sm:$0xff]  ;;  %v306_v56 = vld [vmem:[%s926_s2 + $0x10] sm:$0xff] }
  0x11   : > { %v219_v23 = vld [vmem:[%s215_s26] sm:$0x3]  ;;  %v307_v57 = vld [vmem:[%s926_s2 + $0x18] sm:$0xff] }
  0x12   : > { %727 = vset.pattern.permute.xlu1 %v770_v2  ;;  %257 = vperm.xlu0 %725, %v830_v4   ;;  %v247_v25 = vrot.slane %v219_v23, %v246_v20  ;;  %v271_v26 = vrot.slane %v219_v23, %v270_v21  ;;  %v655_v58 = vld [vmem:[%s926_s2 + $0x20] sm:$0xff] }
  0x13   : > { %261 = vperm.xlu1 %727, %v823_v1   ;;  %707 = vmatprep.mubr.msk.f32.mxu1 %vm332_vm0, %v655_v58 }
  0x16   : > { %729 = vset.pattern.permute.xlu0 %v771_v3 }
  0x17   : > { %728 = vset.pattern.permute.xlu1 %v771_v3  ;;  %241 = vperm.xlu0 %729, %v818_v0  }
  0x18   : > { %231 = vperm.xlu1 %728, %v830_v4  }
  0x1b   : > { %226 = vperm.xlu0 %729, %v839_v5  }
  0x1c   : > { %730 = vset.pattern.permute.xlu1 %v772_v6 }
  0x1d   : > { %293 = vperm.xlu1 %730, %v818_v0  }
  0x1f   : > { %733 = vset.pattern.permute.xlu0 %v772_v6 }
  0x20   : > { %285 = vperm.xlu0 %733, %v830_v4  }
  0x21   : > { %731 = vset.pattern.permute.xlu1 %v770_v2 }
  0x22   : > { %253 = vperm.xlu1 %731, %v839_v5  }
  0x24   : > { %735 = vset.pattern.permute.xlu0 %v771_v3 }
  0x25   : > { %324 = vperm.xlu0 %735, %v310_v9  }
  0x26   : > { %732 = vset.pattern.permute.xlu1 %v772_v6 }
  0x27   : > { %289 = vperm.xlu1 %732, %v823_v1  }
  0x29   : > { %446 = vperm.xlu0 %735, %v659_v11  }
  0x2b   : > { %281 = vperm.xlu1 %732, %v839_v5  }
  0x2d   : > { %456 = vperm.xlu0 %735, %v661_v13   ;;  %v657_v13 = vld [vmem:[%s926_s2 + $0x30] sm:$0xff] }
  0x2f   : > { %734 = vset.pattern.permute.xlu1 %v771_v3 }
  0x30   : > { %329 = vperm.xlu1 %734, %v311_v8  }
  0x31   : > { %736 = vset.pattern.permute.xlu0 %v773_v59 }
  0x32   : > { %566 = vperm.xlu0 %736, %v839_v5  }
  0x34   : > { %319 = vperm.xlu1 %734, %v309_v10  }
  0x36   : > { %578 = vperm.xlu0 %736, %v818_v0  }
  0x38   : > { %314 = vperm.xlu1 %734, %v308_v12   ;;  %v656_v12 = vld [vmem:[%s926_s2 + $0x28] sm:$0xff] }
  0x3c   : > { %451 = vperm.xlu1 %734, %v660_v14   ;;  %v658_v14 = vld [vmem:[%s926_s2 + $0x38] sm:$0xff] }
  0x40   : > { %461 = vperm.xlu1 %734, %v662_v15  }
  0x44   : > { %737 = vset.pattern.permute.xlu1 %v773_v59 }
  0x45   : > { %570 = vperm.xlu1 %737, %v830_v4  }
  0x49   : > { %574 = vperm.xlu1 %737, %v823_v1  }
  0x89   : > { %v237_v18 = vpop.permute.xlu1 %236  ;;  %v266_v19 = vpop.permute.xlu0 %265 }
  0x8a   : > { %v275_v28 = vmul.f32 %v271_v26, %v266_v19  ;;  %v250_v39 = vmul.f32 %v247_v25, %v237_v18 }
  0x8d   : > { %v258_v22 = vpop.permute.xlu0 %257 }
  0x8e   : > { %v262_v24 = vpop.permute.xlu1 %261  ;;  %v273_v36 = vmul.f32 %v271_v26, %v258_v22 }
  0x8f   : > { %v274_v35 = vmul.f32 %v271_v26, %v262_v24 }
  0x91   : > { %v278_v43 = vadd.f32 %v274_v35, %v250_v39 }
  0x92   : > { %v242_v27 = vpop.permute.xlu0 %241 }
  0x93   : > { %v251_v29 = vmul.f32 %v247_v25, %v242_v27  ;;  %v232_v30 = vpop.permute.xlu1 %231 }
  0x94   : > { %v249_v37 = vmul.f32 %v247_v25, %v232_v30 }
  0x95   : > { %v279_v31 = vadd.f32 %v275_v28, %v251_v29 }
  0x96   : > { %v227_v34 = vpop.permute.xlu0 %226  ;;  %v277_v41 = vadd.f32 %v273_v36, %v249_v37 }
  0x97   : > { %v248_v45 = vmul.f32 %v247_v25, %v227_v34 }
  0x98   : > { %v294_v32 = vpop.permute.xlu1 %293 }
  0x99   : > { %v299_v33 = vadd.f32 %v294_v32, %v279_v31 }
  0x9b   : > { %738 = vtanh.f32 %v299_v33  ;;  %v286_v40 = vpop.permute.xlu0 %285 }
  0x9c   : > { %v297_v46 = vadd.f32 %v286_v40, %v277_v41 }
  0x9d   : > { %v254_v38 = vpop.permute.xlu1 %253 }
  0x9e   : > { %v272_v42 = vmul.f32 %v271_v26, %v254_v38 }
  0xa0   : > { %v276_v48 = vadd.f32 %v272_v42, %v248_v45  ;;  %v325_v6 = vpop.permute.xlu0 %324 }
  0xa2   : > { %v290_v44 = vpop.permute.xlu1 %289 }
  0xa3   : > { %v298_v47 = vadd.f32 %v290_v44, %v278_v43 }
  0xa4   : > { %v447_v16 = vpop.permute.xlu0 %446 }
  0xa5   : > { %740 = vtanh.f32 %v298_v47  ;;  %v595_v47 = vstv %s594_s16 }
  0xa6   : > { %v282_v49 = vpop.permute.xlu1 %281  ;;  %742 = vtanh.f32 %v297_v46 }
  0xa7   : > { %v296_v50 = vadd.f32 %v282_v49, %v276_v48 }
  0xa8   : > { %v739_v51 = vpop.eup %738  ;;  %v457_v24 = vpop.permute.xlu0 %456 }
  0xa9   : > { %744 = vtanh.f32 %v296_v50  ;;  %685 = vmatprep.subr.mxu0 %v739_v51 }
  0xaa   : > { %686 = vmatpush3.msra.mxu0 %v739_v51 }
  0xab   : > { %v330_v60 = vpop.permute.xlu1 %329 }
  0xad   : > { %v567_v28 = vpop.permute.xlu0 %566 }
  0xaf   : > { %v320_v62 = vpop.permute.xlu1 %319 }
  0xb1   : > { %v579_v36 = vpop.permute.xlu0 %578 }
  0xb2   : > { %v741_v52 = vpop.eup %740 }
  0xb3   : > { %687 = vmatprep.subr.mxu0 %v741_v52  ;;  %v743_v53 = vpop.eup %742  ;;  %v315_v10 = vpop.permute.xlu1 %314 }
  0xb4   : > { %688 = vmatpush3.msra.mxu0 %v741_v52 }
  0xb5   : > { %689 = vmatprep.subr.mxu0 %v743_v53 }
  0xb6   : > { %v745_v54 = vpop.eup %744  ;;  %690 = vmatpush3.msra.mxu0 %v743_v53 }
  0xb7   : > { %691 = vmatprep.subr.mxu0 %v745_v54  ;;  %v452_v15 = vpop.permute.xlu1 %451 }
  0xb8   : > { %692 = vmatpush3.msra.mxu0 %v745_v54 }
  0xb9   : > { %694 = vmatmul.mubr.msk.f32.vlgmr.msra.gmra.mxu0 %vm332_vm0, %v305_v55 }
  0xba   : > { %696 = vmatprep.mubr.msk.f32.mxu0 %vm332_vm0, %v306_v56 }
  0xbb   : > { %v462_v21 = vpop.permute.xlu1 %461 }
  0xbd   : > { %697 = vmatmul.mubr.msk.f32.gmra.mxu0 %vm332_vm0, %v307_v57 }
  0xc0   : > { %v571_v27 = vpop.permute.xlu1 %570 }
  0xc4   : > { %v575_v35 = vpop.permute.xlu1 %574 }
 0x179   : > { %v695_v61 = vpop.f32.mrf.mxu0 }
 0x17a   : > { %v417_v8 = vadd.f32 %v695_v61, %v320_v62 }
 0x17b   : > { %v411_v63 = vpop.f32.mrf.mxu0 }
 0x17c   : > { %v412_v11 = vadd.f32 %v411_v63, %v315_v10 }
 0x17d   : > { %v698_v2 = vpop.f32.mrf.mxu0 }
 0x17e   : > { %v427_v3 = vadd.f32 %v698_v2, %v330_v60 }
 0x17f   : > { %v421_v7 = vpop.f32.mrf.mxu0 }
 0x180   : > { %746 = vtanh.f32 %v427_v3  ;;  %v422_v9 = vadd.f32 %v421_v7, %v325_v6 }
 0x182   : > { %748 = vtanh.f32 %v422_v9 }
 0x183   : > { %750 = vtanh.f32 %v417_v8 }
 0x184   : > { %752 = vtanh.f32 %v412_v11 }
 0x18d   : > { %v747_v4 = vpop.eup %746 }
 0x18e   : > { %699 = vmatprep.subr.mxu1 %v747_v4 }
 0x18f   : > { %v749_v1 = vpop.eup %748  ;;  %700 = vmatpush3.msra.mxu1 %v747_v4 }
 0x190   : > { %701 = vmatprep.subr.mxu1 %v749_v1  ;;  %v751_v0 = vpop.eup %750 }
 0x191   : > { %702 = vmatpush3.msra.mxu1 %v749_v1  ;;  %v753_v5 = vpop.eup %752 }
 0x192   : > { %703 = vmatprep.subr.mxu1 %v751_v0 }
 0x193   : > { %704 = vmatpush3.msra.mxu1 %v751_v0 }
 0x194   : > { %705 = vmatprep.subr.mxu1 %v753_v5 }
 0x195   : > { %706 = vmatpush3.msra.mxu1 %v753_v5 }
 0x196   : > { %708 = vmatmul.mubr.msk.f32.vlgmr.msra.gmra.mxu1 %vm332_vm0, %v656_v12 }
 0x197   : > { %710 = vmatprep.mubr.msk.f32.mxu1 %vm332_vm0, %v657_v13 }
 0x19a   : > { %711 = vmatmul.mubr.msk.f32.gmra.mxu1 %vm332_vm0, %v658_v14 }
 0x256   : > { %v709_v17 = vpop.f32.mrf.mxu1 }
 0x257   : > { %v548_v18 = vadd.f32 %v709_v17, %v452_v15 }
 0x258   : > { %v542_v19 = vpop.f32.mrf.mxu1 }
 0x259   : > { %v543_v20 = vadd.f32 %v542_v19, %v447_v16  ;;  %754 = vtanh.f32 %v548_v18 }
 0x25a   : > { %v712_v22 = vpop.f32.mrf.mxu1 }
 0x25b   : > { %756 = vtanh.f32 %v543_v20  ;;  %v558_v23 = vadd.f32 %v712_v22, %v462_v21 }
 0x25c   : > { %v552_v25 = vpop.f32.mrf.mxu1 }
 0x25d   : > { %v553_v26 = vadd.f32 %v552_v25, %v457_v24  ;;  %758 = vtanh.f32 %v558_v23 }
 0x25f   : > { %760 = vtanh.f32 %v553_v26 }
 0x266   : > { %v755_v29 = vpop.eup %754 }
 0x267   : > { %v582_v33 = vmul.f32 %v755_v29, %v571_v27 }
 0x268   : > { %v757_v30 = vpop.eup %756 }
 0x269   : > { %v581_v31 = vmul.f32 %v757_v30, %v567_v28 }
 0x26a   : > { %v759_v32 = vpop.eup %758 }
 0x26b   : > { %v585_v37 = vadd.f32 %v582_v33, %v581_v31  ;;  %v584_v40 = vmul.f32 %v759_v32, %v579_v36 }
 0x26c   : > { %v761_v34 = vpop.eup %760 }
 0x26d   : > { %v583_v38 = vmul.f32 %v761_v34, %v575_v35 }
 0x26f   : > { %v586_v39 = vadd.f32 %v585_v37, %v583_v38 }
 0x271   : > { %v587_v41 = vadd.f32 %v586_v39, %v584_v40 }
 0x273   : > { %v588_v42 = vrot.slane %v587_v41, 4 }
 0x275   : > { %v589_v43 = vadd.f32 %v588_v42, %v587_v41 }
 0x277   : > { %v590_v44 = vrot.slane %v589_v43, 2 }
 0x279   : > { %v591_v45 = vadd.f32 %v590_v44, %v589_v43 }
 0x27b   : > { %v592_v46 = vrot.slane %v591_v45, 1 }
 0x27d   : > { %v593_v48 = vadd.f32 %v592_v46, %v591_v45 }
 0x27f   : > { %v596_v49 = vadd.f32 %v595_v47, %v593_v48 }
 0x281   : > { %597 = vst [vmem:[%s218_s19] sm:$0x1] %v596_v49 }
 0x282 PF: > { %s16_s20 = sadd.s32 1, %s768_s20  }
 0x283   : > { %p13_p4 = scmp.ge.s32.totalorder %s16_s20, 4  }
 0x285   :  { %15 = sbr.rel (!%p13_p4) target bundleno = 2 (0x2), region = 72 }

</bundles_post_ra>
